<compile_context>
chip_gen: v6e
topology: v6e:2x2x1
jax: 0.10.0
libtpu: 0.0.40
codegen_flags: <defaults>
</compile_context>

<pallas_src>
import functools

import jax
import jax.numpy as jnp
from jax.experimental import pallas as pl
from jax.experimental.pallas import tpu as pltpu


def _round_up(x, m):
    return (x + m - 1) // m * m


def _pick_tile(dim, max_tile, align):
    """Pick (tile, padded_dim) for one node axis.

    Prefers a tile that divides `dim` exactly (so the big L operand never has
    to be padded in HBM); only falls back to minimal alignment padding.
    """
    if dim <= max_tile:
        return dim, dim                           # full-dim block (always legal)
    t = (max_tile // align) * align
    while t >= align:
        if dim % t == 0:
            return t, dim
        t -= align
    dim_p = _round_up(dim, align)                 # fallback: pad to alignment
    t = (max_tile // align) * align
    while t >= align:
        if dim_p % t == 0:
            return t, dim_p
        t -= align
    return align, dim_p


def _gcn_layer_kernel(l_ref, x_ref, w_ref, b_ref, o_ref, agg_ref, *,
                      apply_relu, tile_k, x_resident):
    # l_ref:   (1, TILE_M, TILE_K) bf16  tile of L (rows x reduction)
    # x_ref:   (1, K_p, F_in_p)    bf16  (resident) or (1, TILE_K, F_in_p)
    # w_ref:   (F_in_p, F_out_p)   bf16  Linear weight, transposed (W^T)
    # b_ref:   (1, F_out_p)        f32   bias
    # o_ref:   (1, TILE_M, F_out_p)      output tile
    # agg_ref: (TILE_M, F_in_p)    f32   VMEM accumulator for (L @ x)
    k = pl.program_id(2)

    @pl.when(k == 0)
    def _init():
        agg_ref[...] = jnp.zeros_like(agg_ref)

    if x_resident:
        start = pl.multiple_of(k * tile_k, tile_k)
        xk = x_ref[0, pl.ds(start, tile_k), :]
    else:
        xk = x_ref[0]

    agg_ref[...] += jnp.dot(l_ref[0], xk, preferred_element_type=jnp.float32)

    @pl.when(k == pl.num_programs(2) - 1)
    def _finalize():
        out = jnp.dot(
            agg_ref[...].astype(w_ref.dtype),      # bf16 operand, f32 accumulate
            w_ref[...],
            preferred_element_type=jnp.float32,
        )
        out = out + b_ref[...]
        if apply_relu:
            out = jnp.maximum(out, 0.0)
        o_ref[0] = out.astype(o_ref.dtype)


def gcn_layer_pallas(L, x_p, w_p, b_p, *, apply_relu, out_dtype,
                     tile_m=512, tile_k=1024):
    """Fused  act((L @ x_p) @ w_p + b_p)  on feature-padded operands.

    L:    (B, M, K)      bf16 graph operator
    x_p:  (B, K, F_in_p) bf16 feature-padded node features
    w_p:  (F_in_p, F_out_p) bf16 padded, transposed Linear weight
    b_p:  (1, F_out_p)   f32 padded bias
    Returns (B, M, F_out_p) in `out_dtype` (feature dim stays padded).
    """
    B, M, K = L.shape
    _, Kx, F_in_p = x_p.shape
    assert w_p.shape[0] == F_in_p, (w_p.shape, F_in_p)
    F_out_p = w_p.shape[1]
    out_bytes = jnp.dtype(out_dtype).itemsize

    TILE_M, M_p = _pick_tile(M, tile_m, 8)
    TILE_K, K_p = _pick_tile(K, tile_k, 128)

    # v7x has 2 TensorCores: make sure at least 2 "parallel" grid iterations.
    while B * (M_p // TILE_M) < 2 and TILE_M % 16 == 0:
        TILE_M //= 2

    # Fallback node-dim padding (zero padding is mathematically inert; the
    # extra rows are sliced off below).  Does not trigger for divisible sizes.
    if M_p != M or K_p != K:
        L = jnp.pad(L, ((0, 0), (0, M_p - M), (0, K_p - K)))
    if K_p != Kx:
        x_p = jnp.pad(x_p, ((0, 0), (0, K_p - Kx), (0, 0)))

    # VMEM footprint (double-buffered inputs/outputs + resident f32 scratch).
    def _need(x_rows):
        return (2 * TILE_M * TILE_K * 2          # L tiles (bf16)
                + 2 * x_rows * F_in_p * 2        # x block(s) (bf16)
                + 2 * F_in_p * F_out_p * 2       # W (bf16)
                + 2 * F_out_p * 4                # bias (f32)
                + 2 * TILE_M * F_out_p * out_bytes
                + TILE_M * F_in_p * 4)           # accumulator scratch

    x_resident = _need(K_p) * 1.3 <= 40 * 1024 * 1024
    need = _need(K_p if x_resident else TILE_K)
    vmem_limit = int(min(max(int(need * 1.3), 16 * 1024 * 1024),
                         48 * 1024 * 1024))

    if x_resident:
        x_spec = pl.BlockSpec((1, K_p, F_in_p), lambda bb, i, k: (bb, 0, 0))
    else:
        x_spec = pl.BlockSpec((1, TILE_K, F_in_p), lambda bb, i, k: (bb, k, 0))

    grid = (B, M_p // TILE_M, K_p // TILE_K)

    out = pl.pallas_call(
        functools.partial(_gcn_layer_kernel, apply_relu=apply_relu,
                          tile_k=TILE_K, x_resident=x_resident),
        out_shape=jax.ShapeDtypeStruct((B, M_p, F_out_p), out_dtype),
        grid=grid,
        in_specs=[
            pl.BlockSpec((1, TILE_M, TILE_K), lambda bb, i, k: (bb, i, k)),
            x_spec,
            pl.BlockSpec((F_in_p, F_out_p), lambda bb, i, k: (0, 0)),
            pl.BlockSpec((1, F_out_p), lambda bb, i, k: (0, 0)),
        ],
        out_specs=pl.BlockSpec((1, TILE_M, F_out_p), lambda bb, i, k: (bb, i, 0)),
        scratch_shapes=[pltpu.VMEM((TILE_M, F_in_p), jnp.float32)],
        compiler_params=pltpu.CompilerParams(
            dimension_semantics=("parallel", "parallel", "arbitrary"),
            vmem_limit_bytes=vmem_limit,
        ),
    )(L, x_p, w_p, b_p)

    if M_p != M:
        out = out[:, :M, :]
    return out


class GCNPallas:
    """Pallas port of GCN with the module defaults:
    dropout=0.0, bnEveryLayer=False, dpEveryLayer=False, outBn=False,
    outDp=False, actFunc=nn.ReLU.  outAct / resnet are supported."""

    def __init__(self, inSize, outSize, hiddenSizeList=(), key=None,
                 outAct=False, resnet=False):
        if key is None:
            key = jax.random.PRNGKey(0)
        self.outAct = outAct
        self.resnet = resnet
        self.inSize = inSize
        self.outSize = outSize

        sizes = [inSize] + list(hiddenSizeList) + [outSize]
        self.ref_params = []   # f32, unpadded (W^T, b) — for the reference check
        self.packed = []       # (W^T padded bf16, b padded f32, fan_in, fan_out)
        for fin, fout in zip(sizes[:-1], sizes[1:]):
            key, wk, bk = jax.random.split(key, 3)
            bound = 1.0 / (fin ** 0.5)
            w = jax.random.uniform(wk, (fout, fin), jnp.float32, -bound, bound)
            b = jax.random.uniform(bk, (fout,), jnp.float32, -bound, bound)
            w_t = jnp.transpose(w)
            self.ref_params.append((w_t, b))
            fin_p, fout_p = _round_up(fin, 128), _round_up(fout, 128)
            w_p = jnp.pad(w_t, ((0, fin_p - fin), (0, fout_p - fout))
                          ).astype(jnp.bfloat16)
            b_p = jnp.pad(b, (0, fout_p - fout)).reshape(1, fout_p)
            self.packed.append((w_p, b_p, fin, fout))

        # One jit over the whole multi-layer forward (amortises launch overhead
        # for tiny graphs; weights are closed over as constants).
        self._forward = jax.jit(self._forward_impl)

    def _forward_impl(self, x, L):
        squeeze = (L.ndim == 2)
        if squeeze:
            L = L[None]
            x = x[None]

        # bf16 operands for the kernel (f32 accumulation inside).
        L_bf = L.astype(jnp.bfloat16)
        fin0 = self.packed[0][2]
        fin0_p = _round_up(fin0, 128)
        x_p = jnp.pad(x, ((0, 0), (0, 0), (0, fin0_p - fin0))
                      ).astype(jnp.bfloat16)

        n_layers = len(self.packed)
        cur_size = fin0
        for li, (w_p, b_p, fin, fout) in enumerate(self.packed):
            is_last = (li == n_layers - 1)
            relu = self.outAct if is_last else True
            out_dtype = jnp.float32 if is_last else jnp.bfloat16
            a_p = gcn_layer_pallas(L_bf, x_p, w_p, b_p,
                                   apply_relu=relu, out_dtype=out_dtype)
            if self.resnet and fout == cur_size:      # same logical shapes
                a_p = a_p + x_p.astype(a_p.dtype)
            x_p = a_p
            cur_size = fout

        out = x_p[:, :, :self.outSize]
        if squeeze:
            out = out[0]
        return out

    def __call__(self, x, L):
        return self._forward(x, L)


def _reference(x, L, params, outAct=False, resnet=False):
    """Plain-JAX f32 replica of the PyTorch forward (default flags)."""
    n = len(params)
    for li, (w_t, b) in enumerate(params):
        is_last = (li == n - 1)
        a = jnp.matmul(jnp.matmul(L, x), w_t) + b
        if (not is_last) or outAct:
            a = jnp.maximum(a, 0.0)
        if resnet and a.shape == x.shape:
            a = a + x
        x = a
    return x


if __name__ == "__main__":
    key = jax.random.PRNGKey(0)
    k_x, k_L, k_p = jax.random.split(key, 3)

    B, N = 2, 16                 # batch of graphs, nodes per graph
    inSize, outSize = 32, 16
    hiddenSizeList = [64, 64]

    x = jax.random.normal(k_x, (B, N, inSize), jnp.float32)
    # random row-normalized graph operator (like a normalized adjacency)
    A = jax.random.uniform(k_L, (B, N, N), jnp.float32)
    L = A / jnp.sum(A, axis=-1, keepdims=True)

    model = GCNPallas(inSize, outSize, hiddenSizeList, key=k_p)

    out = jax.block_until_ready(model(x, L))

    ref = _reference(x, L, model.ref_params)
    assert out.shape == (B, N, outSize), (out.shape, (B, N, outSize))
    err = float(jnp.max(jnp.abs(out - ref)))
    # bf16 operands / bf16 inter-layer activations vs the f32 reference.
    assert err < 3e-2, err

    print("KERNEL_OK")
</pallas_src>

<mosaic_0001>
module attributes {stable_mosaic.version = 11 : i64} {
  func.func @_gcn_layer_kernel(%arg0: i32, %arg1: i32, %arg2: i32, %arg3: memref<1x16x16xbf16, #tpu.memory_space<vmem>>, %arg4: memref<1x16x128xbf16, #tpu.memory_space<vmem>>, %arg5: memref<128x128xbf16, #tpu.memory_space<vmem>>, %arg6: memref<1x128xf32, #tpu.memory_space<vmem>>, %arg7: memref<1x16x128xbf16, #tpu.memory_space<vmem>>, %arg8: memref<16x128xf32, #tpu.memory_space<vmem>>) attributes {dimension_semantics = [#tpu.dimension_semantics<parallel>, #tpu.dimension_semantics<parallel>, #tpu.dimension_semantics<arbitrary>], iteration_bounds = array<i64: 2, 1, 1>, scalar_prefetch = 0 : i64, scratch_operands = 1 : i64, tpu.core_type = #tpu.core_type<tc>, window_params = [{transform_indices = @transform_0, window_bounds = array<i64: 1, 16, 16>}, {transform_indices = @transform_1, window_bounds = array<i64: 1, 16, 128>}, {pipeline_mode = #tpu.pipeline_mode<synchronous>, transform_indices = @transform_2, window_bounds = array<i64: 128, 128>}, {pipeline_mode = #tpu.pipeline_mode<synchronous>, transform_indices = @transform_3, window_bounds = array<i64: 1, 128>}, {transform_indices = @transform_4, window_bounds = array<i64: 1, 16, 128>}]} {
    %c0_i32 = arith.constant 0 : i32
    %0 = arith.cmpi eq, %arg2, %c0_i32 : i32
    %1 = arith.extui %0 : i1 to i32
    %c0_i32_0 = arith.constant 0 : i32
    %2 = arith.cmpi ne, %1, %c0_i32_0 : i32
    scf.if %2 {
      %cst_11 = arith.constant 0.000000e+00 : f32
      %17 = vector.broadcast %cst_11 : f32 to vector<16x128xf32>
      %c0_12 = arith.constant 0 : index
      %c0_13 = arith.constant 0 : index
      %18 = vector.load %arg8[%c0_12, %c0_13] : memref<16x128xf32, #tpu.memory_space<vmem>>, vector<16x128xf32>
      tpu.vector_store %arg8[%c0_12, %c0_13], %17 {strides = array<i32>} : memref<16x128xf32, #tpu.memory_space<vmem>>, vector<16x128xf32>,
    } else {
    }
    %c16_i32 = arith.constant 16 : i32
    %3 = arith.muli %arg2, %c16_i32 : i32
    %4 = tpu.assume_multiple %3, 16 : i32
    %c0 = arith.constant 0 : index
    %5 = arith.index_cast %4 : i32 to index
    %c0_1 = arith.constant 0 : index
    %6 = vector.load %arg4[%c0, %5, %c0_1] : memref<1x16x128xbf16, #tpu.memory_space<vmem>>, vector<1x16x128xbf16>
    %7 = vector.shape_cast %6 : vector<1x16x128xbf16> to vector<16x128xbf16>
    %c0_2 = arith.constant 0 : index
    %c0_3 = arith.constant 0 : index
    %8 = vector.load %arg8[%c0_2, %c0_3] : memref<16x128xf32, #tpu.memory_space<vmem>>, vector<16x128xf32>
    %c0_4 = arith.constant 0 : index
    %c0_5 = arith.constant 0 : index
    %c0_6 = arith.constant 0 : index
    %9 = vector.load %arg3[%c0_4, %c0_5, %c0_6] : memref<1x16x16xbf16, #tpu.memory_space<vmem>>, vector<1x16x16xbf16>
    %10 = vector.shape_cast %9 : vector<1x16x16xbf16> to vector<16x16xbf16>
    %cst = arith.constant dense<0.000000e+00> : vector<16x128xf32>
    %11 = tpu.matmul %10, %7, %cst {dimension_numbers = #tpu.dot_dimension_numbers<[1], [0], [0], [1], [0, 0, 1, 1], [], []>} : vector<16x16xbf16>, vector<16x128xbf16>, vector<16x128xf32> -> vector<16x128xf32>
    %12 = arith.addf %8, %11 : vector<16x128xf32>
    %c0_7 = arith.constant 0 : index
    %c0_8 = arith.constant 0 : index
    %13 = vector.load %arg8[%c0_7, %c0_8] : memref<16x128xf32, #tpu.memory_space<vmem>>, vector<16x128xf32>
    tpu.vector_store %arg8[%c0_7, %c0_8], %12 {strides = array<i32>} : memref<16x128xf32, #tpu.memory_space<vmem>>, vector<16x128xf32>,
    %c0_i32_9 = arith.constant 0 : i32
    %14 = arith.cmpi eq, %arg2, %c0_i32_9 : i32
    %15 = arith.extui %14 : i1 to i32
    %c0_i32_10 = arith.constant 0 : i32
    %16 = arith.cmpi ne, %15, %c0_i32_10 : i32
    scf.if %16 {
      %c0_11 = arith.constant 0 : index
      %c0_12 = arith.constant 0 : index
      %17 = vector.load %arg8[%c0_11, %c0_12] : memref<16x128xf32, #tpu.memory_space<vmem>>, vector<16x128xf32>
      %18 = arith.truncf %17 : vector<16x128xf32> to vector<16x128xbf16>
      %c0_13 = arith.constant 0 : index
      %c0_14 = arith.constant 0 : index
      %19 = vector.load %arg5[%c0_13, %c0_14] : memref<128x128xbf16, #tpu.memory_space<vmem>>, vector<128x128xbf16>
      %cst_15 = arith.constant dense<0.000000e+00> : vector<16x128xf32>
      %20 = tpu.matmul %18, %19, %cst_15 {dimension_numbers = #tpu.dot_dimension_numbers<[1], [0], [0], [1], [0, 0, 1, 1], [], []>} : vector<16x128xbf16>, vector<128x128xbf16>, vector<16x128xf32> -> vector<16x128xf32>
      %c0_16 = arith.constant 0 : index
      %c0_17 = arith.constant 0 : index
      %21 = vector.load %arg6[%c0_16, %c0_17] : memref<1x128xf32, #tpu.memory_space<vmem>>, vector<1x128xf32>
      %22 = vector.broadcast %21 : vector<1x128xf32> to vector<16x128xf32>
      %23 = arith.addf %20, %22 : vector<16x128xf32>
      %cst_18 = arith.constant 0.000000e+00 : f32
      %24 = vector.broadcast %cst_18 : f32 to vector<16x128xf32>
      %25 = arith.maximumf %23, %24 : vector<16x128xf32>
      %26 = arith.truncf %25 : vector<16x128xf32> to vector<16x128xbf16>
      %c0_19 = arith.constant 0 : index
      %c0_20 = arith.constant 0 : index
      %c0_21 = arith.constant 0 : index
      %27 = vector.load %arg7[%c0_19, %c0_20, %c0_21] : memref<1x16x128xbf16, #tpu.memory_space<vmem>>, vector<1x16x128xbf16>
      %28 = vector.shape_cast %27 : vector<1x16x128xbf16> to vector<16x128xbf16>
      %29 = vector.shape_cast %26 : vector<16x128xbf16> to vector<1x16x128xbf16>
      tpu.vector_store %arg7[%c0_19, %c0_20, %c0_21], %29 {strides = array<i32>} : memref<1x16x128xbf16, #tpu.memory_space<vmem>>, vector<1x16x128xbf16>,
    } else {
    }
    return
  }
  func.func @transform_0(%arg0: i32, %arg1: i32, %arg2: i32) -> (i32, i32, i32) {
    %c0_i32 = arith.constant 0 : i32
    return %arg0, %arg1, %arg2 : i32, i32, i32
  }
  func.func @transform_1(%arg0: i32, %arg1: i32, %arg2: i32) -> (i32, i32, i32) {
    %c0_i32 = arith.constant 0 : i32
    %c0_i32_0 = arith.constant 0 : i32
    %c0_i32_1 = arith.constant 0 : i32
    return %arg0, %c0_i32, %c0_i32_0 : i32, i32, i32
  }
  func.func @transform_2(%arg0: i32, %arg1: i32, %arg2: i32) -> (i32, i32) {
    %c0_i32 = arith.constant 0 : i32
    %c0_i32_0 = arith.constant 0 : i32
    %c0_i32_1 = arith.constant 0 : i32
    return %c0_i32, %c0_i32_0 : i32, i32
  }
  func.func @transform_3(%arg0: i32, %arg1: i32, %arg2: i32) -> (i32, i32) {
    %c0_i32 = arith.constant 0 : i32
    %c0_i32_0 = arith.constant 0 : i32
    %c0_i32_1 = arith.constant 0 : i32
    return %c0_i32, %c0_i32_0 : i32, i32
  }
  func.func @transform_4(%arg0: i32, %arg1: i32, %arg2: i32) -> (i32, i32, i32) {
    %c0_i32 = arith.constant 0 : i32
    %c0_i32_0 = arith.constant 0 : i32
    return %arg0, %arg1, %c0_i32 : i32, i32, i32
  }
}

module attributes {stable_mosaic.version = 11 : i64} {
  func.func @_gcn_layer_kernel(%arg0: i32, %arg1: i32, %arg2: i32, %arg3: memref<1x16x16xbf16, #tpu.memory_space<vmem>>, %arg4: memref<1x16x128xbf16, #tpu.memory_space<vmem>>, %arg5: memref<128x128xbf16, #tpu.memory_space<vmem>>, %arg6: memref<1x128xf32, #tpu.memory_space<vmem>>, %arg7: memref<1x16x128xf32, #tpu.memory_space<vmem>>, %arg8: memref<16x128xf32, #tpu.memory_space<vmem>>) attributes {dimension_semantics = [#tpu.dimension_semantics<parallel>, #tpu.dimension_semantics<parallel>, #tpu.dimension_semantics<arbitrary>], iteration_bounds = array<i64: 2, 1, 1>, scalar_prefetch = 0 : i64, scratch_operands = 1 : i64, tpu.core_type = #tpu.core_type<tc>, window_params = [{transform_indices = @transform_0, window_bounds = array<i64: 1, 16, 16>}, {transform_indices = @transform_1, window_bounds = array<i64: 1, 16, 128>}, {pipeline_mode = #tpu.pipeline_mode<synchronous>, transform_indices = @transform_2, window_bounds = array<i64: 128, 128>}, {pipeline_mode = #tpu.pipeline_mode<synchronous>, transform_indices = @transform_3, window_bounds = array<i64: 1, 128>}, {transform_indices = @transform_4, window_bounds = array<i64: 1, 16, 128>}]} {
    %c0_i32 = arith.constant 0 : i32
    %0 = arith.cmpi eq, %arg2, %c0_i32 : i32
    %1 = arith.extui %0 : i1 to i32
    %c0_i32_0 = arith.constant 0 : i32
    %2 = arith.cmpi ne, %1, %c0_i32_0 : i32
    scf.if %2 {
      %cst_11 = arith.constant 0.000000e+00 : f32
      %17 = vector.broadcast %cst_11 : f32 to vector<16x128xf32>
      %c0_12 = arith.constant 0 : index
      %c0_13 = arith.constant 0 : index
      %18 = vector.load %arg8[%c0_12, %c0_13] : memref<16x128xf32, #tpu.memory_space<vmem>>, vector<16x128xf32>
      tpu.vector_store %arg8[%c0_12, %c0_13], %17 {strides = array<i32>} : memref<16x128xf32, #tpu.memory_space<vmem>>, vector<16x128xf32>,
    } else {
    }
    %c16_i32 = arith.constant 16 : i32
    %3 = arith.muli %arg2, %c16_i32 : i32
    %4 = tpu.assume_multiple %3, 16 : i32
    %c0 = arith.constant 0 : index
    %5 = arith.index_cast %4 : i32 to index
    %c0_1 = arith.constant 0 : index
    %6 = vector.load %arg4[%c0, %5, %c0_1] : memref<1x16x128xbf16, #tpu.memory_space<vmem>>, vector<1x16x128xbf16>
    %7 = vector.shape_cast %6 : vector<1x16x128xbf16> to vector<16x128xbf16>
    %c0_2 = arith.constant 0 : index
    %c0_3 = arith.constant 0 : index
    %8 = vector.load %arg8[%c0_2, %c0_3] : memref<16x128xf32, #tpu.memory_space<vmem>>, vector<16x128xf32>
    %c0_4 = arith.constant 0 : index
    %c0_5 = arith.constant 0 : index
    %c0_6 = arith.constant 0 : index
    %9 = vector.load %arg3[%c0_4, %c0_5, %c0_6] : memref<1x16x16xbf16, #tpu.memory_space<vmem>>, vector<1x16x16xbf16>
    %10 = vector.shape_cast %9 : vector<1x16x16xbf16> to vector<16x16xbf16>
    %cst = arith.constant dense<0.000000e+00> : vector<16x128xf32>
    %11 = tpu.matmul %10, %7, %cst {dimension_numbers = #tpu.dot_dimension_numbers<[1], [0], [0], [1], [0, 0, 1, 1], [], []>} : vector<16x16xbf16>, vector<16x128xbf16>, vector<16x128xf32> -> vector<16x128xf32>
    %12 = arith.addf %8, %11 : vector<16x128xf32>
    %c0_7 = arith.constant 0 : index
    %c0_8 = arith.constant 0 : index
    %13 = vector.load %arg8[%c0_7, %c0_8] : memref<16x128xf32, #tpu.memory_space<vmem>>, vector<16x128xf32>
    tpu.vector_store %arg8[%c0_7, %c0_8], %12 {strides = array<i32>} : memref<16x128xf32, #tpu.memory_space<vmem>>, vector<16x128xf32>,
    %c0_i32_9 = arith.constant 0 : i32
    %14 = arith.cmpi eq, %arg2, %c0_i32_9 : i32
    %15 = arith.extui %14 : i1 to i32
    %c0_i32_10 = arith.constant 0 : i32
    %16 = arith.cmpi ne, %15, %c0_i32_10 : i32
    scf.if %16 {
      %c0_11 = arith.constant 0 : index
      %c0_12 = arith.constant 0 : index
      %17 = vector.load %arg8[%c0_11, %c0_12] : memref<16x128xf32, #tpu.memory_space<vmem>>, vector<16x128xf32>
      %18 = arith.truncf %17 : vector<16x128xf32> to vector<16x128xbf16>
      %c0_13 = arith.constant 0 : index
      %c0_14 = arith.constant 0 : index
      %19 = vector.load %arg5[%c0_13, %c0_14] : memref<128x128xbf16, #tpu.memory_space<vmem>>, vector<128x128xbf16>
      %cst_15 = arith.constant dense<0.000000e+00> : vector<16x128xf32>
      %20 = tpu.matmul %18, %19, %cst_15 {dimension_numbers = #tpu.dot_dimension_numbers<[1], [0], [0], [1], [0, 0, 1, 1], [], []>} : vector<16x128xbf16>, vector<128x128xbf16>, vector<16x128xf32> -> vector<16x128xf32>
      %c0_16 = arith.constant 0 : index
      %c0_17 = arith.constant 0 : index
      %21 = vector.load %arg6[%c0_16, %c0_17] : memref<1x128xf32, #tpu.memory_space<vmem>>, vector<1x128xf32>
      %22 = vector.broadcast %21 : vector<1x128xf32> to vector<16x128xf32>
      %23 = arith.addf %20, %22 : vector<16x128xf32>
      %c0_18 = arith.constant 0 : index
      %c0_19 = arith.constant 0 : index
      %c0_20 = arith.constant 0 : index
      %24 = vector.load %arg7[%c0_18, %c0_19, %c0_20] : memref<1x16x128xf32, #tpu.memory_space<vmem>>, vector<1x16x128xf32>
      %25 = vector.shape_cast %24 : vector<1x16x128xf32> to vector<16x128xf32>
      %26 = vector.shape_cast %23 : vector<16x128xf32> to vector<1x16x128xf32>
      tpu.vector_store %arg7[%c0_18, %c0_19, %c0_20], %26 {strides = array<i32>} : memref<1x16x128xf32, #tpu.memory_space<vmem>>, vector<1x16x128xf32>,
    } else {
    }
    return
  }
  func.func @transform_0(%arg0: i32, %arg1: i32, %arg2: i32) -> (i32, i32, i32) {
    %c0_i32 = arith.constant 0 : i32
    return %arg0, %arg1, %arg2 : i32, i32, i32
  }
  func.func @transform_1(%arg0: i32, %arg1: i32, %arg2: i32) -> (i32, i32, i32) {
    %c0_i32 = arith.constant 0 : i32
    %c0_i32_0 = arith.constant 0 : i32
    %c0_i32_1 = arith.constant 0 : i32
    return %arg0, %c0_i32, %c0_i32_0 : i32, i32, i32
  }
  func.func @transform_2(%arg0: i32, %arg1: i32, %arg2: i32) -> (i32, i32) {
    %c0_i32 = arith.constant 0 : i32
    %c0_i32_0 = arith.constant 0 : i32
    %c0_i32_1 = arith.constant 0 : i32
    return %c0_i32, %c0_i32_0 : i32, i32
  }
  func.func @transform_3(%arg0: i32, %arg1: i32, %arg2: i32) -> (i32, i32) {
    %c0_i32 = arith.constant 0 : i32
    %c0_i32_0 = arith.constant 0 : i32
    %c0_i32_1 = arith.constant 0 : i32
    return %c0_i32, %c0_i32_0 : i32, i32
  }
  func.func @transform_4(%arg0: i32, %arg1: i32, %arg2: i32) -> (i32, i32, i32) {
    %c0_i32 = arith.constant 0 : i32
    %c0_i32_0 = arith.constant 0 : i32
    return %arg0, %arg1, %c0_i32 : i32, i32, i32
  }
}

</mosaic_0001>

<bundles_post_ra>
// kernel: _forward_impl.3
= control target key start
LH: loop header
LB: loop body
LE: loop exit
PB: predicated region body
PF: predicated region fallthrough
CT: control target
= control target key end

     0   :  { %s751_s15 = smov 0   ;;  %s753_s16 = smov 0   ;;  %s819_s0 = inlined_call_operand.vmem [shape: bf16[2,16,16], index: 0, kind: input, shape index: {}]   ;;  %s820_s1 = inlined_call_operand.vmem [shape: bf16[2,16,128], index: 1, kind: input, shape index: {}]   ;;  %s821_s2 = inlined_call_operand.vmem [shape: bf16[128,128], index: 2, kind: input, shape index: {}]   ;;  %s822_s3 = inlined_call_operand.vmem [shape: f32[1,128], index: 3, kind: input, shape index: {}]   ;;  %s823_s4 = inlined_call_operand.vmem [shape: bf16[2,16,128], index: 4, kind: output, shape index: {}]  }
   0x1   :  { %s755_s17 = smov 0  }
   0x2 LB: > { %s33_s18 = sadd.s32 1, %s718_s16  ;;  %p594_p0 = scmp.ge.s32.totalorder %s722_s17, 1  ;;  %s722_s17 = sphi %s755_s17, %s14_s17   ;;  %s718_s16 = sphi %s753_s16, %s825_s16   ;;  %s714_s15 = sphi %s751_s15, %s824_s15  }
   0x3   : > { %p35_p1 = scmp.ge.s32.totalorder %s33_s18, 2  ;;  %p205_p2 = scmp.lt.s32.totalorder %s722_s17, 3 }
   0x5   : > { %s827_s18 = smov (%p35_p1, %s33_s18), 0  ;;  %p206_p3 = pnand %p594_p0, %p205_p2 }
   0x6   : > { %p248_p4 = scmp.lt.s32.totalorder (!%p206_p3), %s714_s15, 1 }
   0x7   : > { %209 = sbr.rel (%p206_p3) target bundleno = 422 (0x1a6), region = 36 }
   0xc   : > { %v724_v0 = vmov 0.0   ;;  %vm725_vm0 = vmmov 0   ;;  %v692_v1 = vld [vmem:[%s821_s2 + $0x38] sm:$0xff]   ;;  %s829_s15 = smov (!%p248_p4, %s714_s15), 1  ;;  %v693_v2 = vld [vmem:[%s821_s2 + $0x30] sm:$0xff]   ;;  %v694_v3 = vld [vmem:[%s821_s2 + $0x28] sm:$0xff]  }
   0xd   : > { %638 = vmatprep.subr.bf16.mxu0 %v724_v0  ;;  %640 = vmatprep.mubr.msk.bf16.mxu0 %vm725_vm0, %v724_v0  ;;  %s775_s23 = sshll.u32 %s829_s15, 3  ;;  %vm304_vm1 = vcmask 130048   ;;  %v695_v6 = vld [vmem:[%s821_s2 + $0x20] sm:$0xff]   ;;  %v696_v7 = vld [vmem:[%s821_s2 + $0x18] sm:$0xff]   ;;  %v697_v8 = vld [vmem:[%s821_s2 + $0x10] sm:$0xff]  }
   0xe   : > { %644 = vmatprep.subr.bf16.mxu1 %v724_v0  ;;  %660 = vmatprep.mubr.msk.bf16.mxu1 %vm725_vm0, %v724_v0  ;;  %s258_s26 = scalar_lea.vmem %s819_s0, %s775_s23  ;;  %s264_s29 = scalar_lea.vmem %s820_s1, %s775_s23  ;;  %v698_v9 = vld [vmem:[%s821_s2 + $0x8] sm:$0xff]   ;;  %v699_v10 = vld [vmem:[%s821_s2] sm:$0xff]  }
   0xf   : > { %645 = vmatpush3.bf16.msra.mxu1 %v692_v1  ;;  %v690_v4 = vld [vmem:[%s264_s29] sm:$0xff]   ;;  %s273_s24 = scalar_lea.vmem %s823_s4, %s775_s23 }
  0x10   : > { %646 = vmatprep.subr.bf16.mxu1 %v724_v0  ;;  %v691_v5 = vld [vmem:[%s258_s26] sm:$0xff]   ;;  %639 = vmatpush3.bf16.msra.mxu0 %v690_v4 }
  0x11   : > { %v604_v16 = vld [vmem:[%s822_s3] ss:$0 sm:$0xff] }
  0x13   : > { %647 = vmatpush3.bf16.msra.mxu1 %v693_v2  ;;  %641 = vmatmul.mubr.msk.bf16.vlgmr.msra.gmra.mxu0 %vm304_vm1, %v691_v5 }
  0x14   : > { %648 = vmatprep.subr.bf16.mxu1 %v724_v0 }
  0x17   : > { %649 = vmatpush3.bf16.msra.mxu1 %v694_v3 }
  0x18   : > { %650 = vmatprep.subr.bf16.mxu1 %v724_v0 }
  0x1b   : > { %651 = vmatpush3.bf16.msra.mxu1 %v695_v6 }
  0x1c   : > { %652 = vmatprep.subr.bf16.mxu1 %v724_v0 }
  0x1f   : > { %653 = vmatpush3.bf16.msra.mxu1 %v696_v7 }
  0x20   : > { %654 = vmatprep.subr.bf16.mxu1 %v724_v0 }
  0x23   : > { %655 = vmatpush3.bf16.msra.mxu1 %v697_v8 }
  0x24   : > { %656 = vmatprep.subr.bf16.mxu1 %v724_v0 }
  0x27   : > { %657 = vmatpush3.bf16.msra.mxu1 %v698_v9 }
  0x28   : > { %658 = vmatprep.subr.bf16.mxu1 %v724_v0 }
  0x2b   : > { %659 = vmatpush3.bf16.msra.mxu1 %v699_v10 }
  0xd3   : > { %v342_v11 = vpop.f32.mrf.mxu0 }
  0xd5   : > { %v642_v12 = vpop.f32.mrf.mxu0 }
  0xd7   : > { %v345_v13 = vpop.f32.mrf.mxu0 }
  0xd8   : > { %v358_v14 = vpack.c.bf16 %v345_v13, %v342_v11 }
  0xd9   : > { %v643_v15 = vpop.f32.mrf.mxu0 }
  0xda   : > { %661 = vmatmul.mubr.bf16.vlgmr.msra.gmra.mxu1 %v358_v14 }
 0x19a   : > { %v464_v17 = vpop.f32.mrf.mxu1 }
 0x19b   : > { %v465_v19 = vadd.f32 %v604_v16, %v464_v17 }
 0x19c   : > { %v662_v18 = vpop.f32.mrf.mxu1 }
 0x19d   : > { %v471_v23 = vmax.f32 %v465_v19, 0.0 }
 0x19e   : > { %v467_v20 = vpop.f32.mrf.mxu1 }
 0x19f   : > { %v468_v21 = vadd.f32 %v604_v16, %v467_v20 }
 0x1a0   : > { %v663_v22 = vpop.f32.mrf.mxu1 }
 0x1a1   : > { %v472_v24 = vmax.f32 %v468_v21, 0.0 }
 0x1a3   : > { %v625_v25 = vpack.c.bf16 %v472_v24, %v471_v23 }
 0x1a5   : > { %626 = vst [vmem:[%s273_s24] sm:$0xff] %v625_v25  }
 0x1a6 PF: > { %s14_s17 = sadd.s32 1, %s722_s17   ;;  %s824_s15 = smov %s718_s16 }
 0x1a7   : > { %p11_p5 = scmp.ge.s32.totalorder %s14_s17, 4   ;;  %s825_s16 = smov %s827_s18 }
 0x1a9   :  { %13 = sbr.rel (!%p11_p5) target bundleno = 2 (0x2), region = 78 }

// kernel: _forward_impl.5
= control target key start
LH: loop header
LB: loop body
LE: loop exit
PB: predicated region body
PF: predicated region fallthrough
CT: control target
= control target key end

     0   :  { %9 = vsyncpa [#allocation4], 0  ;;  %s966_s0 = inlined_call_operand.vmem [shape: bf16[2,16,16], index: 0, kind: input, shape index: {}]   ;;  %s967_s1 = inlined_call_operand.vmem [shape: bf16[2,16,128], index: 1, kind: input, shape index: {}]   ;;  %s968_s2 = inlined_call_operand.vmem [shape: bf16[128,128], index: 2, kind: input, shape index: {}]   ;;  %s969_s3 = inlined_call_operand.vmem [shape: f32[1,128], index: 3, kind: input, shape index: {}]   ;;  %s970_s4 = inlined_call_operand.hbm [shape: f32[2,16,128], index: 4, kind: output, shape index: {}]  }
   0x1   :  { %11 = vsyncpa [#allocation4 + $0x1], 0  ;;  %s822_s15 = smov 0   ;;  %s824_s16 = smov 0  }
   0x2   :  { %s826_s17 = smov 0   ;;  %s828_s18 = smov 0  }
   0x3   :  { %s830_s19 = smov 0   ;;  %s832_s20 = smov 0  }
   0x4 LB: > { %s578_s21 = sadd.s32 4294967295, %s790_s20   ;;  %s579_s22 = sadd.s32 4294967294, %s790_s20   ;;  %s790_s20 = sphi %s832_s20, %s17_s20   ;;  %s786_s19 = sphi %s830_s19, %s977_s19   ;;  %s782_s18 = sphi %s828_s18, %s976_s18   ;;  %s778_s17 = sphi %s826_s17, %s975_s17   ;;  %s774_s16 = sphi %s824_s16, %s974_s16   ;;  %s770_s15 = sphi %s822_s15, %s973_s15  }
   0x5   : > { %s36_s23 = sadd.s32 1, %s786_s19  ;;  %s143_s24 = sadd.s32 1, %s778_s17 }
   0x6   : > { %p38_p0 = scmp.ge.s32.totalorder %s36_s23, 2  ;;  %p153_p1 = scmp.ne.s32.totalorder %s778_s17, %s774_s16 }
   0x7   : > { %p154_p2 = scmp.eq.s32.totalorder %s578_s21, 1  ;;  %p159_p3 = scmp.ne.s32.totalorder %s774_s16, %s770_s15 }
   0x8   : > { %s979_s23 = smov (%p38_p0, %s36_s23), 0  ;;  %p160_p5 = scmp.eq.s32.totalorder %s579_s22, 1 }
   0x9   : > { %p862_p4 = por %p154_p2, %p153_p1  ;;  %s138_s26 = ssub.s32 %s786_s19, %s979_s23 }
   0xa   : > { %p582_p6 = scmp.ge.s32.totalorder %s790_s20, 1  ;;  %p141_p7 = scmp.eq.s32.totalorder %s138_s26, 0 }
   0xb   : > { %p869_p8 = por %p160_p5, %p159_p3  ;;  %p208_p9 = scmp.lt.s32.totalorder %s790_s20, 3 }
   0xc   : > { %s875_s28 = scalar_select %p141_p7, %s778_s17, %s143_s24  }
   0xd   : > { %p209_p10 = pnand %p582_p6, %p208_p9 }
   0xe   : > { %p247_p11 = scmp.lt.s32.totalorder (!%p209_p10), %s782_s18, 1  ;;  %s607_s24 = sshll.u32 (!%p209_p10), %s782_s18, 8 }
   0xf   : > { %212 = sbr.rel (%p209_p10) target bundleno = 440 (0x1b8), region = 36  ;;  %s919_s30 = scalar_lea.hbm (!%p209_p10), %s970_s4, %s607_s24 }
  0x14   : > { %v792_v0 = vmov 0.0   ;;  %vm793_vm0 = vmmov 0   ;;  %v706_v1 = vld [vmem:[%s968_s2 + $0x38] sm:$0xff]   ;;  %s248_s5 = scalar_select %p247_p11, %s782_s18, 1  ;;  %v707_v2 = vld [vmem:[%s968_s2 + $0x30] sm:$0xff]   ;;  %v708_v4 = vld [vmem:[%s968_s2 + $0x28] sm:$0xff]  }
  0x15   : > { %619 = vmatprep.subr.bf16.mxu0 %v792_v0  ;;  %621 = vmatprep.mubr.msk.bf16.mxu0 %vm793_vm0, %v792_v0  ;;  %vm294_vm1 = vcmask 130048   ;;  %v709_v6 = vld [vmem:[%s968_s2 + $0x20] sm:$0xff]   ;;  %v710_v7 = vld [vmem:[%s968_s2 + $0x18] sm:$0xff]   ;;  %v711_v8 = vld [vmem:[%s968_s2 + $0x10] sm:$0xff]   ;;  %s794_s18 = smov [#allocation3]  }
  0x16   : > { %625 = vmatprep.subr.bf16.mxu1 %v792_v0  ;;  %641 = vmatprep.mubr.msk.bf16.mxu1 %vm793_vm0, %v792_v0  ;;  %s605_s8 = sshll.u32 %s248_s5, 3  ;;  %v712_v9 = vld [vmem:[%s968_s2 + $0x8] sm:$0xff]   ;;  %v713_v10 = vld [vmem:[%s968_s2] sm:$0xff]   ;;  %s718_s7 = sshll.u32 %s794_s18, 4  ;;  %s719_s7 = int_to_ptr.vmem [resolvable:$false] %s718_s7 }
  0x17   : > { %626 = vmatpush3.bf16.msra.mxu1 %v706_v1  ;;  %s257_s11 = scalar_lea.vmem %s966_s0, %s605_s8  ;;  %s263_s14 = scalar_lea.vmem %s967_s1, %s605_s8  ;;  %v591_v16 = vld [vmem:[%s969_s3] ss:$0 sm:$0xff] }
  0x18   : > { %627 = vmatprep.subr.bf16.mxu1 %v792_v0  ;;  %v704_v3 = vld [vmem:[%s263_s14] sm:$0xff]   ;;  %s720_s8 = scalar_lea.vmem %s719_s7, 512 }
  0x19   : > { %v705_v5 = vld [vmem:[%s257_s11] sm:$0xff]   ;;  %620 = vmatpush3.bf16.msra.mxu0 %v704_v3  ;;  %s243_s11 = sand.u32 1, %s774_s16  }
  0x1a   : > { %s583_s12 = sshll.u32 %s243_s11, 4  ;;  %s921_s5 = scalar_lea.sflag [#allocation4], %s243_s11 }
  0x1b   : > { %628 = vmatpush3.bf16.msra.mxu1 %v707_v2  ;;  %s245_s21 = scalar_lea.vmem [#allocation3], %s583_s12 }
  0x1c   : > { %629 = vmatprep.subr.bf16.mxu1 %v792_v0  ;;  %622 = vmatmul.mubr.msk.bf16.vlgmr.msra.gmra.mxu0 %vm294_vm1, %v705_v5  ;;  %s479_s22 = sshll.u32 %s245_s21, 4  ;;  %s914_s22 = int_to_ptr.vmem [resolvable:$true] %s479_s22 }
  0x1d   : > { %s714_s6 = scalar_lea.vmem %s914_s22, 256  ;;  %p721_p1 = scmp.lt.s32.totalorder %s914_s22, %s719_s7 }
  0x1e   : > { %p715_p12 = scmp.ne.s32.totalorder %s914_s22, %s714_s6  ;;  %p722_p2 = scmp.lt.s32.totalorder %s720_s8, %s714_s6 }
  0x1f   : > { %630 = vmatpush3.bf16.msra.mxu1 %v708_v4 }
  0x20   : > { %631 = vmatprep.subr.bf16.mxu1 %v792_v0  ;;  %p716_p13 = pnand %p715_p12, %p862_p4  ;;  %p723_p3 = por %p722_p2, %p721_p1 }
  0x22   : > { %p717_p0 = pneg %p716_p13 }
  0x23   : > { %632 = vmatpush3.bf16.msra.mxu1 %v709_v6 }
  0x24   : > { %633 = vmatprep.subr.bf16.mxu1 %v792_v0  ;;  %p724_p5 = pnand %p723_p3, %p717_p0 }
  0x27   : > { %634 = vmatpush3.bf16.msra.mxu1 %v710_v7 }
  0x28   : > { %635 = vmatprep.subr.bf16.mxu1 %v792_v0 }
  0x2b   : > { %636 = vmatpush3.bf16.msra.mxu1 %v711_v8 }
  0x2c   : > { %637 = vmatprep.subr.bf16.mxu1 %v792_v0 }
  0x2f   : > { %638 = vmatpush3.bf16.msra.mxu1 %v712_v9 }
  0x30   : > { %639 = vmatprep.subr.bf16.mxu1 %v792_v0 }
  0x33   : > { %640 = vmatpush3.bf16.msra.mxu1 %v713_v10 }
  0xdc   : > { %v332_v11 = vpop.f32.mrf.mxu0 }
  0xde   : > { %v623_v12 = vpop.f32.mrf.mxu0 }
  0xe0   : > { %v335_v13 = vpop.f32.mrf.mxu0 }
  0xe1   : > { %v348_v14 = vpack.c.bf16 %v335_v13, %v332_v11 }
  0xe2   : > { %v624_v15 = vpop.f32.mrf.mxu0 }
  0xe3   : > { %642 = vmatmul.mubr.bf16.vlgmr.msra.gmra.mxu1 %v348_v14 }
 0x1a3   : > { %v454_v17 = vpop.f32.mrf.mxu1 }
 0x1a4   : > { %v455_v18 = vadd.f32 %v591_v16, %v454_v17 }
 0x1a5   : > { %v643_v19 = vpop.f32.mrf.mxu1 }
 0x1a6   : > { %461 = vst [vmem:[%s245_s21] sm:$0xff] %v455_v18 }
 0x1a7   : > { %v457_v20 = vpop.f32.mrf.mxu1 }
 0x1a8   : > { %v458_v21 = vadd.f32 %v591_v16, %v457_v20 }
 0x1a9   : > { %v644_v22 = vpop.f32.mrf.mxu1 }
 0x1aa   : > { %462 = vst [vmem:[%s245_s21 + $0x8] sm:$0xff] %v458_v21 }
 0x1ab   : > { %727 = shalt.err (!%p724_p5)
}
 0x1ac   : > { %s728_s9 = scalar_lea.hbm %s919_s30, 256  ;;  %s732_s12 = scalar_lea.hbm %s970_s4, 512 }
 0x1ad   : > { %p729_p6 = scmp.ne.s32.totalorder %s919_s30, %s728_s9  ;;  %p733_p10 = scmp.lt.s32.totalorder %s919_s30, %s970_s4 }
 0x1ae   : > { %p734_p11 = scmp.lt.s32.totalorder %s732_s12, %s728_s9 }
 0x1af   : > { %p730_p7 = pnand %p729_p6, %p862_p4 }
 0x1b0   : > { %p735_p12 = por %p734_p11, %p733_p10 }
 0x1b1   : > { %p731_p9 = pneg %p730_p7 }
 0x1b3   : > { %p736_p13 = pnand %p735_p12, %p731_p9 }
 0x1b5   : > { %739 = shalt.err (!%p736_p13)
}
 0x1b6   : > { %s795_s21 = smov 128   ;;  %s796_s24 = smov 8  }
 0x1b7   : > { %645 = dma.vmem_to_hbm [thread:$0]  (%p862_p4), %s914_s22, 256, %s919_s30, %s921_s5, %s795_s21, %s795_s21, %s796_s24  }
 0x1b8 PF: > { %p651_p0 = scmp.ge.s32.totalorder %s790_s20, 2  ;;  %s494_s26 = sand.u32 1, %s770_s15  }
 0x1b9   : > { %s495_s29 = scalar_lea.sflag [#allocation4], %s494_s26 }
 0x1ba   : > { %p648_p1 = pnand %p651_p0, %p869_p8 }
 0x1bc   : > { %p649_p2 = pneg %p648_p1 }
 0x1be   : > { %765 = dma.done.wait (%p649_p2), %s495_s29, 256  }
 0x1bf   : > { %767 = vsyncadd (%p649_p2), %s495_s29, 4294967040  ;;  %s17_s20 = sadd.s32 1, %s790_s20   ;;  %s973_s15 = smov %s774_s16 }
 0x1c0   : > { %p14_p3 = scmp.ge.s32.totalorder %s17_s20, 4   ;;  %s974_s16 = smov %s778_s17 }
 0x1c1   : > { %s975_s17 = smov %s875_s28  ;;  %s976_s18 = smov %s786_s19 }
 0x1c2   : > { %s977_s19 = smov %s979_s23  ;;  %16 = sbr.rel (!%p14_p3) target bundleno = 4 (0x4), region = 83 }
 0x1c7   :  { %500 = vsyncpa [#allocation4], 1 }
 0x1c8   :  { %502 = vsyncpa [#allocation4 + $0x1], 1 }

</bundles_post_ra>
